<compile_context>
chip_gen: v7x
topology: tpu7x:2x2x1
jax: 0.10.0
libtpu: 0.0.40
codegen_flags: <defaults>
</compile_context>

<pallas_src>
import math

import jax
import jax.numpy as jnp
from jax.experimental import pallas as pl
from jax.experimental.pallas import tpu as pltpu


def _round_up(x, m):
    return (x + m - 1) // m * m


def _vmem_capacity_bytes():
    """Physical VMEM per TensorCore; conservative fallback = v7x (64 MiB)."""
    try:
        info = pltpu.get_tpu_info()
        cap = getattr(info, "vmem_capacity_bytes", None)
        if cap:
            return int(cap)
    except Exception:
        pass
    return 64 * 1024 * 1024


# --------------------------------------------------------------------------
# Kernel: one (tm, d_pad) row tile, weights fully resident in VMEM.
# --------------------------------------------------------------------------
def _make_ffn_kernel(d_model, d_pad):
    need_mask = d_pad != d_model
    inv_d = 1.0 / float(d_model)
    eps = 1e-5  # nn.LayerNorm default

    def kernel(x_ref, w1_ref, b1_ref, w2_ref, b2_ref, g_ref, beta_ref, o_ref):
        x = x_ref[...]                                   # (tm, d_pad), native dtype
        xm = x.astype(w1_ref.dtype)                      # bf16 MXU operand

        # linear1 + bias + ReLU, immediately downcast: only the narrow hidden
        # tile stays live (largest intermediate halved).
        h = jnp.maximum(
            jnp.dot(xm, w1_ref[...], preferred_element_type=jnp.float32)
            + b1_ref[...].astype(jnp.float32),
            0.0,
        ).astype(w2_ref.dtype)                           # (tm, dff) bf16

        # linear2 (bf16 operands, f32 accumulation) + bias
        y = jnp.dot(h, w2_ref[...], preferred_element_type=jnp.float32)
        y = y + b2_ref[...].astype(jnp.float32)          # (tm, d_pad) f32

        # residual in f32
        r = x.astype(jnp.float32) + y
        if need_mask:
            lane = jax.lax.broadcasted_iota(jnp.int32, r.shape, dimension=1)
            r = jnp.where(lane < d_model, r, 0.0)        # mask once, before both sums

        # LayerNorm over the true d_model lanes, single pass over r.
        s1 = jnp.sum(r, axis=-1, keepdims=True)
        s2 = jnp.sum(r * r, axis=-1, keepdims=True)
        mean = s1 * inv_d
        var = jnp.maximum(s2 * inv_d - mean * mean, 0.0)
        nrm = (r - mean) * jax.lax.rsqrt(var + eps)

        o_ref[...] = (nrm * g_ref[...].astype(jnp.float32)
                      + beta_ref[...].astype(jnp.float32)).astype(o_ref.dtype)

    return kernel


# --------------------------------------------------------------------------
# One-time parameter packing (lane padding + dtype cast hoisted out of calls).
# --------------------------------------------------------------------------
def pack_params(w1, b1, w2, b2, gamma, beta, *, param_dtype=jnp.bfloat16):
    """w1:(d,dff) b1:(1,dff) w2:(dff,d) b2/gamma/beta:(1,d). Pads lanes to 128x."""
    d_model, dff = w1.shape
    d_pad = _round_up(max(d_model, 1), 128)
    pad = d_pad - d_model
    if pad:
        w1 = jnp.pad(w1, ((0, pad), (0, 0)))
        w2 = jnp.pad(w2, ((0, 0), (0, pad)))
        b2 = jnp.pad(b2, ((0, 0), (0, pad)))
        gamma = jnp.pad(gamma, ((0, 0), (0, pad)))
        beta = jnp.pad(beta, ((0, 0), (0, pad)))
    return dict(
        w1=w1.astype(param_dtype),
        b1=b1.astype(jnp.float32).reshape(1, dff),
        w2=w2.astype(param_dtype),
        b2=b2.astype(jnp.float32).reshape(1, d_pad),
        gamma=gamma.astype(jnp.float32).reshape(1, d_pad),
        beta=beta.astype(jnp.float32).reshape(1, d_pad),
        d_model=d_model, d_pad=d_pad, dff=dff,
    )


# --------------------------------------------------------------------------
# Wrapper
# --------------------------------------------------------------------------
def ffn_layer(tgt, params, *, tm=None):
    """tgt: (seq, batch, d_model). params: from pack_params. Returns same shape/dtype."""
    seq, bsz, d_model = tgt.shape
    assert d_model == params["d_model"]
    d_pad, dff = params["d_pad"], params["dff"]
    param_dtype = params["w1"].dtype

    x = tgt.reshape(seq * bsz, d_model)
    n = x.shape[0]
    if d_pad != d_model:
        # only for atypical widths (d_model not a multiple of 128)
        x = jnp.pad(x, ((0, 0), (0, d_pad - d_model)))

    vmem_cap = _vmem_capacity_bytes()
    if tm is None:
        # 128 MiB parts (v5e/v6e): bigger row tile; v7x (64 MiB): 256.
        tm = 512 if vmem_cap >= 96 * 1024 * 1024 else 256

    # Row tile: multiple of 8 sublanes, clamped to the workload; force >=2 grid
    # steps when there are enough rows so both v7x TensorCores get work.
    tm_eff = min(tm, _round_up(n, 8))
    if n >= 32:
        tm_eff = min(tm_eff, _round_up(pl.cdiv(n, 2), 8))
    tm_eff = max(_round_up(tm_eff, 8), 8)

    # ---- honest VMEM footprint (weights & biases counted double-buffered) ----
    pbytes = jnp.dtype(param_dtype).itemsize
    xbytes = jnp.dtype(x.dtype).itemsize
    obytes = jnp.dtype(tgt.dtype).itemsize

    def footprint(rows):
        weights = 2 * (2 * d_pad * dff * pbytes)          # W1 + W2, 2 buffers
        biases = 2 * (dff + 3 * d_pad) * 4                # b1, b2, gamma, beta (f32)
        io = 2 * rows * d_pad * (xbytes + obytes)         # x / out tiles, 2 buffers
        hid = rows * dff * (4 + pbytes)                    # pre-ReLU f32 + bf16 h
        ln = 2 * rows * d_pad * 4                          # residual / LN temporaries
        return weights + biases + io + hid + ln

    budget = int(0.85 * vmem_cap)                          # headroom for compiler scratch
    while tm_eff > 8 and footprint(tm_eff) > budget:
        tm_eff = max(_round_up(tm_eff // 2, 8), 8)
    # TODO(synk): if the resident weights alone exceed the budget (very large
    # dff on v7x), tile the dff axis with a second grid dimension + accumulator.
    vmem_limit = int(min(max(int(1.2 * footprint(tm_eff)), 32 * 1024 * 1024), budget))

    grid = (pl.cdiv(n, tm_eff),)
    kernel = _make_ffn_kernel(d_model, d_pad)

    out = pl.pallas_call(
        kernel,
        out_shape=jax.ShapeDtypeStruct((n, d_pad), tgt.dtype),
        grid_spec=pltpu.PrefetchScalarGridSpec(
            num_scalar_prefetch=0,
            grid=grid,
            in_specs=[
                pl.BlockSpec((tm_eff, d_pad), lambda i: (i, 0)),   # x rows
                pl.BlockSpec((d_pad, dff), lambda i: (0, 0)),      # W1 (resident)
                pl.BlockSpec((1, dff), lambda i: (0, 0)),          # b1
                pl.BlockSpec((dff, d_pad), lambda i: (0, 0)),      # W2 (resident)
                pl.BlockSpec((1, d_pad), lambda i: (0, 0)),        # b2
                pl.BlockSpec((1, d_pad), lambda i: (0, 0)),        # LN gamma
                pl.BlockSpec((1, d_pad), lambda i: (0, 0)),        # LN beta
            ],
            out_specs=pl.BlockSpec((tm_eff, d_pad), lambda i: (i, 0)),
        ),
        compiler_params=pltpu.CompilerParams(
            dimension_semantics=("parallel",),
            vmem_limit_bytes=vmem_limit,
        ),
    )(x, params["w1"], params["b1"], params["w2"], params["b2"],
      params["gamma"], params["beta"])

    if d_pad != d_model:
        out = out[:, :d_model]
    return out.reshape(seq, bsz, d_model)


# --------------------------------------------------------------------------
# Deterministic synthetic init mirroring FFNLayer.__init__/_reset_parameters.
# --------------------------------------------------------------------------
def init_params(key, d_model, dim_feedforward):
    k1, k2, k3, k4 = jax.random.split(key, 4)

    def xavier(k, fan_in, fan_out):
        bound = math.sqrt(6.0 / (fan_in + fan_out))
        # stored (in, out) so the kernel computes x @ W  (== x @ torch_weight.T)
        return jax.random.uniform(k, (fan_in, fan_out), jnp.float32, -bound, bound)

    w1 = xavier(k1, d_model, dim_feedforward)
    w2 = xavier(k2, dim_feedforward, d_model)
    b1 = jax.random.uniform(k3, (1, dim_feedforward), jnp.float32,
                            -1.0 / math.sqrt(d_model), 1.0 / math.sqrt(d_model))
    b2 = jax.random.uniform(k4, (1, d_model), jnp.float32,
                            -1.0 / math.sqrt(dim_feedforward),
                            1.0 / math.sqrt(dim_feedforward))
    gamma = jnp.ones((1, d_model), jnp.float32)   # nn.LayerNorm defaults
    beta = jnp.zeros((1, d_model), jnp.float32)
    return w1, b1, w2, b2, gamma, beta


if __name__ == "__main__":
    key = jax.random.PRNGKey(0)
    seq, batch, d_model, dff = 8, 2, 32, 64

    kx, kp = jax.random.split(key)
    tgt = jax.random.normal(kx, (seq, batch, d_model), jnp.float32)
    w1, b1, w2, b2, gamma, beta = init_params(kp, d_model, dff)

    params = pack_params(w1, b1, w2, b2, gamma, beta)     # one-time pad + bf16 cast
    out = jax.block_until_ready(ffn_layer(tgt, params))

    # pure-JAX reference with the same bf16-operand / f32-accumulate matmuls
    x = tgt.reshape(-1, d_model)
    xb = x.astype(jnp.bfloat16)
    w1b = w1.astype(jnp.bfloat16)
    w2b = w2.astype(jnp.bfloat16)
    h = jnp.maximum(jnp.dot(xb, w1b, preferred_element_type=jnp.float32) + b1, 0.0)
    r = x + jnp.dot(h.astype(jnp.bfloat16), w2b, preferred_element_type=jnp.float32) + b2
    mu = r.mean(-1, keepdims=True)
    var = ((r - mu) ** 2).mean(-1, keepdims=True)
    ref = ((r - mu) * jax.lax.rsqrt(var + 1e-5) * gamma + beta).reshape(seq, batch, d_model)

    assert out.shape == ref.shape and out.dtype == ref.dtype
    err = float(jnp.max(jnp.abs(out - ref)))
    assert err < 5e-3, f"mismatch vs reference, max abs err = {err}"

    print("KERNEL_OK")
</pallas_src>

<mosaic_0001>
module attributes {stable_mosaic.version = 11 : i64} {
  func.func @kernel(%arg0: i32, %arg1: memref<16x128xf32, #tpu.memory_space<vmem>>, %arg2: memref<128x64xbf16, #tpu.memory_space<vmem>>, %arg3: memref<1x64xf32, #tpu.memory_space<vmem>>, %arg4: memref<64x128xbf16, #tpu.memory_space<vmem>>, %arg5: memref<1x128xf32, #tpu.memory_space<vmem>>, %arg6: memref<1x128xf32, #tpu.memory_space<vmem>>, %arg7: memref<1x128xf32, #tpu.memory_space<vmem>>, %arg8: memref<16x128xf32, #tpu.memory_space<vmem>>) attributes {dimension_semantics = [#tpu.dimension_semantics<parallel>], iteration_bounds = array<i64: 1>, scalar_prefetch = 0 : i64, scratch_operands = 0 : i64, tpu.core_type = #tpu.core_type<tc>, window_params = [{transform_indices = @transform_0, window_bounds = array<i64: 16, 128>}, {pipeline_mode = #tpu.pipeline_mode<synchronous>, transform_indices = @transform_1, window_bounds = array<i64: 128, 64>}, {pipeline_mode = #tpu.pipeline_mode<synchronous>, transform_indices = @transform_2, window_bounds = array<i64: 1, 64>}, {pipeline_mode = #tpu.pipeline_mode<synchronous>, transform_indices = @transform_3, window_bounds = array<i64: 64, 128>}, {pipeline_mode = #tpu.pipeline_mode<synchronous>, transform_indices = @transform_4, window_bounds = array<i64: 1, 128>}, {pipeline_mode = #tpu.pipeline_mode<synchronous>, transform_indices = @transform_5, window_bounds = array<i64: 1, 128>}, {pipeline_mode = #tpu.pipeline_mode<synchronous>, transform_indices = @transform_6, window_bounds = array<i64: 1, 128>}, {transform_indices = @transform_7, window_bounds = array<i64: 16, 128>}]} {
    %c0 = arith.constant 0 : index
    %c0_0 = arith.constant 0 : index
    %0 = vector.load %arg1[%c0, %c0_0] : memref<16x128xf32, #tpu.memory_space<vmem>>, vector<16x128xf32>
    %1 = arith.truncf %0 : vector<16x128xf32> to vector<16x128xbf16>
    %c0_1 = arith.constant 0 : index
    %c0_2 = arith.constant 0 : index
    %2 = vector.load %arg2[%c0_1, %c0_2] : memref<128x64xbf16, #tpu.memory_space<vmem>>, vector<128x64xbf16>
    %cst = arith.constant dense<0.000000e+00> : vector<16x64xf32>
    %3 = tpu.matmul %1, %2, %cst {dimension_numbers = #tpu.dot_dimension_numbers<[1], [0], [0], [1], [0, 0, 1, 1], [], []>} : vector<16x128xbf16>, vector<128x64xbf16>, vector<16x64xf32> -> vector<16x64xf32>
    %c0_3 = arith.constant 0 : index
    %c0_4 = arith.constant 0 : index
    %4 = vector.load %arg3[%c0_3, %c0_4] : memref<1x64xf32, #tpu.memory_space<vmem>>, vector<1x64xf32>
    %5 = vector.broadcast %4 : vector<1x64xf32> to vector<16x64xf32>
    %6 = arith.addf %3, %5 : vector<16x64xf32>
    %cst_5 = arith.constant 0.000000e+00 : f32
    %7 = vector.broadcast %cst_5 : f32 to vector<16x64xf32>
    %8 = arith.maximumf %6, %7 : vector<16x64xf32>
    %9 = arith.truncf %8 : vector<16x64xf32> to vector<16x64xbf16>
    %c0_6 = arith.constant 0 : index
    %c0_7 = arith.constant 0 : index
    %10 = vector.load %arg4[%c0_6, %c0_7] : memref<64x128xbf16, #tpu.memory_space<vmem>>, vector<64x128xbf16>
    %cst_8 = arith.constant dense<0.000000e+00> : vector<16x128xf32>
    %11 = tpu.matmul %9, %10, %cst_8 {dimension_numbers = #tpu.dot_dimension_numbers<[1], [0], [0], [1], [0, 0, 1, 1], [], []>} : vector<16x64xbf16>, vector<64x128xbf16>, vector<16x128xf32> -> vector<16x128xf32>
    %c0_9 = arith.constant 0 : index
    %c0_10 = arith.constant 0 : index
    %12 = vector.load %arg5[%c0_9, %c0_10] : memref<1x128xf32, #tpu.memory_space<vmem>>, vector<1x128xf32>
    %13 = vector.broadcast %12 : vector<1x128xf32> to vector<16x128xf32>
    %14 = arith.addf %11, %13 : vector<16x128xf32>
    %15 = arith.addf %0, %14 : vector<16x128xf32>
    %16 = tpu.iota {dimensions = array<i32: 1>} : vector<16x128xi32>
    %c32_i32 = arith.constant 32 : i32
    %17 = vector.broadcast %c32_i32 : i32 to vector<16x128xi32>
    %18 = arith.cmpi slt, %16, %17 : vector<16x128xi32>
    %cst_11 = arith.constant 0.000000e+00 : f32
    %19 = vector.broadcast %cst_11 : f32 to vector<16x128xf32>
    %20 = arith.select %18, %15, %19 : vector<16x128xi1>, vector<16x128xf32>
    %cst_12 = arith.constant dense<0.000000e+00> : vector<16xf32>
    %21 = vector.multi_reduction <add>, %20, %cst_12 [1] : vector<16x128xf32> to vector<16xf32>
    %22 = vector.shape_cast %21 : vector<16xf32> to vector<16x1xf32>
    %23 = arith.mulf %20, %20 : vector<16x128xf32>
    %cst_13 = arith.constant dense<0.000000e+00> : vector<16xf32>
    %24 = vector.multi_reduction <add>, %23, %cst_13 [1] : vector<16x128xf32> to vector<16xf32>
    %25 = vector.shape_cast %24 : vector<16xf32> to vector<16x1xf32>
    %cst_14 = arith.constant 3.125000e-02 : f32
    %26 = vector.broadcast %cst_14 : f32 to vector<16x1xf32>
    %27 = arith.mulf %22, %26 : vector<16x1xf32>
    %cst_15 = arith.constant 3.125000e-02 : f32
    %28 = vector.broadcast %cst_15 : f32 to vector<16x1xf32>
    %29 = arith.mulf %25, %28 : vector<16x1xf32>
    %30 = arith.mulf %27, %27 : vector<16x1xf32>
    %31 = arith.subf %29, %30 : vector<16x1xf32>
    %cst_16 = arith.constant 0.000000e+00 : f32
    %32 = vector.broadcast %cst_16 : f32 to vector<16x1xf32>
    %33 = arith.maximumf %31, %32 : vector<16x1xf32>
    %34 = vector.broadcast %27 : vector<16x1xf32> to vector<16x128xf32>
    %35 = arith.subf %20, %34 : vector<16x128xf32>
    %cst_17 = arith.constant 9.99999974E-6 : f32
    %36 = vector.broadcast %cst_17 : f32 to vector<16x1xf32>
    %37 = arith.addf %33, %36 : vector<16x1xf32>
    %38 = math.rsqrt %37 : vector<16x1xf32>
    %39 = vector.broadcast %38 : vector<16x1xf32> to vector<16x128xf32>
    %40 = arith.mulf %35, %39 : vector<16x128xf32>
    %c0_18 = arith.constant 0 : index
    %c0_19 = arith.constant 0 : index
    %41 = vector.load %arg6[%c0_18, %c0_19] : memref<1x128xf32, #tpu.memory_space<vmem>>, vector<1x128xf32>
    %42 = vector.broadcast %41 : vector<1x128xf32> to vector<16x128xf32>
    %43 = arith.mulf %40, %42 : vector<16x128xf32>
    %c0_20 = arith.constant 0 : index
    %c0_21 = arith.constant 0 : index
    %44 = vector.load %arg7[%c0_20, %c0_21] : memref<1x128xf32, #tpu.memory_space<vmem>>, vector<1x128xf32>
    %45 = vector.broadcast %44 : vector<1x128xf32> to vector<16x128xf32>
    %46 = arith.addf %43, %45 : vector<16x128xf32>
    %c0_22 = arith.constant 0 : index
    %c0_23 = arith.constant 0 : index
    %47 = vector.load %arg8[%c0_22, %c0_23] : memref<16x128xf32, #tpu.memory_space<vmem>>, vector<16x128xf32>
    tpu.vector_store %arg8[%c0_22, %c0_23], %46 {strides = array<i32>} : memref<16x128xf32, #tpu.memory_space<vmem>>, vector<16x128xf32>,
    return
  }
  func.func @transform_0(%arg0: i32) -> (i32, i32) {
    %c0_i32 = arith.constant 0 : i32
    %c0_i32_0 = arith.constant 0 : i32
    return %arg0, %c0_i32 : i32, i32
  }
  func.func @transform_1(%arg0: i32) -> (i32, i32) {
    %c0_i32 = arith.constant 0 : i32
    %c0_i32_0 = arith.constant 0 : i32
    %c0_i32_1 = arith.constant 0 : i32
    return %c0_i32, %c0_i32_0 : i32, i32
  }
  func.func @transform_2(%arg0: i32) -> (i32, i32) {
    %c0_i32 = arith.constant 0 : i32
    %c0_i32_0 = arith.constant 0 : i32
    %c0_i32_1 = arith.constant 0 : i32
    return %c0_i32, %c0_i32_0 : i32, i32
  }
  func.func @transform_3(%arg0: i32) -> (i32, i32) {
    %c0_i32 = arith.constant 0 : i32
    %c0_i32_0 = arith.constant 0 : i32
    %c0_i32_1 = arith.constant 0 : i32
    return %c0_i32, %c0_i32_0 : i32, i32
  }
  func.func @transform_4(%arg0: i32) -> (i32, i32) {
    %c0_i32 = arith.constant 0 : i32
    %c0_i32_0 = arith.constant 0 : i32
    %c0_i32_1 = arith.constant 0 : i32
    return %c0_i32, %c0_i32_0 : i32, i32
  }
  func.func @transform_5(%arg0: i32) -> (i32, i32) {
    %c0_i32 = arith.constant 0 : i32
    %c0_i32_0 = arith.constant 0 : i32
    %c0_i32_1 = arith.constant 0 : i32
    return %c0_i32, %c0_i32_0 : i32, i32
  }
  func.func @transform_6(%arg0: i32) -> (i32, i32) {
    %c0_i32 = arith.constant 0 : i32
    %c0_i32_0 = arith.constant 0 : i32
    %c0_i32_1 = arith.constant 0 : i32
    return %c0_i32, %c0_i32_0 : i32, i32
  }
  func.func @transform_7(%arg0: i32) -> (i32, i32) {
    %c0_i32 = arith.constant 0 : i32
    %c0_i32_0 = arith.constant 0 : i32
    return %arg0, %c0_i32 : i32, i32
  }
}

</mosaic_0001>

<bundles_post_ra>
// kernel: tpu_custom_call.1
= control target key start
LH: loop header
LB: loop body
LE: loop exit
PB: predicated region body
PF: predicated region fallthrough
CT: control target
= control target key end

     0   :  { %v409_v1 = vmov 0.0   ;;  %vm410_vm0 = vmmov 0   ;;  %s520_s0 = inlined_call_operand.vmem [shape: f32[16,128], index: 0, kind: input, shape index: {}]   ;;  %s521_s1 = inlined_call_operand.vmem [shape: bf16[128,64], index: 1, kind: input, shape index: {}]   ;;  %s522_s2 = inlined_call_operand.vmem [shape: f32[1,64], index: 2, kind: input, shape index: {}]   ;;  %s523_s3 = inlined_call_operand.vmem [shape: bf16[64,128], index: 3, kind: input, shape index: {}]   ;;  %s524_s4 = inlined_call_operand.vmem [shape: f32[1,128], index: 4, kind: input, shape index: {}]   ;;  %s525_s5 = inlined_call_operand.vmem [shape: f32[1,128], index: 5, kind: input, shape index: {}]   ;;  %s526_s6 = inlined_call_operand.vmem [shape: f32[1,128], index: 6, kind: input, shape index: {}]   ;;  %s527_s7 = inlined_call_operand.hbm [shape: f32[16,128], index: 7, kind: output, shape index: {}]  }
   0x1   :  { %v369_v0 = vld [vmem:[%s521_s1] sm:$0xff]   ;;  %332 = vmatprep.subr.bf16.mxu0 %v409_v1  ;;  %352 = vmatprep.subr.bf16.mxu1 %v409_v1  ;;  %v370_v2 = vld [vmem:[%s521_s1 + $0x8] sm:$0xff]   ;;  %v371_v3 = vld [vmem:[%s521_s1 + $0x10] sm:$0xff]  }
   0x2   :  { %333 = vmatpush3.bf16.msra.mxu0 %v369_v0  ;;  %348 = vmatprep.mubr.msk.bf16.mxu0 %vm410_vm0, %v409_v1  ;;  %v377_v4 = vld [vmem:[%s523_s3] sm:$0xff]   ;;  %v372_v5 = vld [vmem:[%s521_s1 + $0x18] sm:$0xff]   ;;  %v378_v6 = vld [vmem:[%s523_s3 + $0x8] sm:$0xff]  }
   0x3   :  { %334 = vmatprep.subr.bf16.mxu0 %v409_v1  ;;  %360 = vmatprep.mubr.msk.bf16.mxu1 %vm410_vm0, %v409_v1 }
   0x4   :  { %353 = vmatpush3.bf16.msra.mxu1 %v377_v4 }
   0x5   :  { %354 = vmatprep.subr.bf16.mxu1 %v409_v1 }
   0x6   :  { %335 = vmatpush3.bf16.msra.mxu0 %v370_v2 }
   0x7   :  { %336 = vmatprep.subr.bf16.mxu0 %v409_v1 }
   0xa   :  { %337 = vmatpush3.bf16.msra.mxu0 %v371_v3 }
   0xb   :  { %338 = vmatprep.subr.bf16.mxu0 %v409_v1 }
   0xc   :  { %12 = vsyncpa [#allocation3], 0  ;;  %v373_v7 = vld [vmem:[%s521_s1 + $0x20] sm:$0xff]   ;;  %355 = vmatpush3.bf16.msra.mxu1 %v378_v6  ;;  %v374_v8 = vld [vmem:[%s521_s1 + $0x28] sm:$0xff]   ;;  %vm185_vm1 = vcmask 523264   ;;  %v232_v26 = vlaneseq  ;;  %s411_s9 = smov [#allocation2]  }
   0xd   :  { %356 = vmatprep.subr.bf16.mxu1 %v409_v1  ;;  %v375_v9 = vld [vmem:[%s521_s1 + $0x30] sm:$0xff]   ;;  %v376_v10 = vld [vmem:[%s521_s1 + $0x38] sm:$0xff]   ;;  %v28_v11 = vld [vmem:[%s520_s0] sm:$0xff]  ;;  %s290_s10 = sshll.u32 %s411_s9, 4  ;;  %s291_s10 = int_to_ptr.vmem [resolvable:$true] %s290_s10 }
   0xe   :  { %339 = vmatpush3.bf16.msra.mxu0 %v372_v5  ;;  %v29_v12 = vld [vmem:[%s520_s0 + $0x8] sm:$0xff]  ;;  %v379_v14 = vld [vmem:[%s523_s3 + $0x10] sm:$0xff]   ;;  %v380_v15 = vld [vmem:[%s523_s3 + $0x18] sm:$0xff]   ;;  %v233_v28 = vand.u32 127, %v232_v26  ;;  %s385_s11 = scalar_lea.vmem %s291_s10, 256  ;;  %p390_p1 = scmp.lt.s32.totalorder %s291_s10, %s291_s10 }
   0xf   :  { %340 = vmatprep.subr.bf16.mxu0 %v409_v1  ;;  %v30_v13 = vpack.c.bf16 %v29_v12, %v28_v11  ;;  %v301_v16 = vld [vmem:[%s522_s2] ss:$0 sm:$0xff]  ;;  %p386_p0 = scmp.ne.s32.totalorder %s291_s10, %s385_s11  ;;  %p391_p2 = scmp.lt.s32.totalorder %s385_s11, %s385_s11 }
  0x10   :  { %357 = vmatpush3.bf16.msra.mxu1 %v379_v14  ;;  %v310_v27 = vld [vmem:[%s524_s4] ss:$0 sm:$0xff]  ;;  %vm234_vm2 = vcmp.lt.s32.totalorder %v233_v28, 32 }
  0x11   :  { %358 = vmatprep.subr.bf16.mxu1 %v409_v1  ;;  %v316_v59 = vld [vmem:[%s525_s5] ss:$0 sm:$0xff]  ;;  %p392_p3 = por %p391_p2, %p390_p1 }
  0x12   :  { %341 = vmatpush3.bf16.msra.mxu0 %v373_v7  ;;  %v317_v61 = vld [vmem:[%s526_s6] ss:$0 sm:$0xff] }
  0x13   :  { %342 = vmatprep.subr.bf16.mxu0 %v409_v1  ;;  %p393_p4 = pnand %p392_p3, %p386_p0 }
  0x14   :  { %359 = vmatpush3.bf16.msra.mxu1 %v380_v15 }
  0x16   :  { %343 = vmatpush3.bf16.msra.mxu0 %v374_v8 }
  0x17   :  { %344 = vmatprep.subr.bf16.mxu0 %v409_v1 }
  0x1a   :  { %345 = vmatpush3.bf16.msra.mxu0 %v375_v9 }
  0x1b   :  { %346 = vmatprep.subr.bf16.mxu0 %v409_v1 }
  0x1e   :  { %347 = vmatpush3.bf16.msra.mxu0 %v376_v10 }
  0x21   :  { %349 = vmatmul.mubr.bf16.vlgmr.msra.gmra.mrb[0].mxu0 %v30_v13 }
  0xf4   :  { %v136_v17 = vpop.f32.mrb[0].mxu0 }
  0xf5   :  { %v137_v18 = vadd.f32 %v301_v16, %v136_v17  ;;  %v350_v19 = vpop.f32.mrb[1].mxu0 }
  0xf6   :  { %v139_v20 = vpop.f32.mrb[2].mxu0 }
  0xf7   :  { %v140_v21 = vadd.f32 %v301_v16, %v139_v20  ;;  %v351_v22 = vpop.f32.mrb[3].mxu0  ;;  %v143_v23 = vmax.f32 %v137_v18, 0.0 }
  0xf9   :  { %v144_v24 = vmax.f32 %v140_v21, 0.0 }
  0xfb   :  { %v145_v25 = vpack.c.bf16 %v144_v24, %v143_v23 }
  0xfd   :  { %361 = vmatmul.mubr.msk.bf16.vlgmr.msra.gmra.mrb[0].mxu1 %vm185_vm1, %v145_v25 }
 0x1d0   :  { %v223_v29 = vpop.f32.mrb[0].mxu1 }
 0x1d1   :  { %v224_v30 = vadd.f32 %v310_v27, %v223_v29  ;;  %v362_v31 = vpop.f32.mrb[1].mxu1 }
 0x1d2   :  { %v226_v32 = vpop.f32.mrb[2].mxu1 }
 0x1d3   :  { %v230_v33 = vadd.f32 %v224_v30, %v28_v11  ;;  %v227_v34 = vadd.f32 %v310_v27, %v226_v32  ;;  %v363_v35 = vpop.f32.mrb[3].mxu1 }
 0x1d5   :  { %v231_v36 = vadd.f32 %v227_v34, %v29_v12  ;;  %v235_v37 = vsel %vm234_vm2, %v230_v33, 0.0 }
 0x1d6   :  { %237 = vadd.xlane.f32.xlu0 %v235_v37  ;;  %v241_v38 = vmul.f32 %v235_v37, %v235_v37 }
 0x1d7   :  { %v236_v39 = vsel %vm234_vm2, %v231_v36, 0.0 }
 0x1d8   :  { %243 = vadd.xlane.f32.xlu1 %v241_v38  ;;  %v242_v40 = vmul.f32 %v236_v39, %v236_v39 }
 0x1da   :  { %239 = vadd.xlane.f32.xlu0 %v236_v39 }
 0x1dc   :  { %245 = vadd.xlane.f32.xlu1 %v242_v40 }
 0x263   :  { %v238_v41 = vpop.xlane.xlu0 %237 }
 0x264   :  { %v247_v42 = vmul.f32 0.03125, %v238_v41 }
 0x265   :  { %v244_v43 = vpop.xlane.xlu1 %243 }
 0x266   :  { %v251_v44 = vmul.f32 %v247_v42, %v247_v42  ;;  %v249_v45 = vmul.f32 0.03125, %v244_v43  ;;  %v257_v57 = vsub.f32 %v235_v37, %v247_v42 }
 0x267   :  { %v240_v46 = vpop.xlane.xlu0 %239 }
 0x268   :  { %v253_v47 = vsub.f32 %v249_v45, %v251_v44  ;;  %v248_v48 = vmul.f32 0.03125, %v240_v46 }
 0x269   :  { %v246_v49 = vpop.xlane.xlu1 %245 }
 0x26a   :  { %v255_v50 = vmax.f32 %v253_v47, 0.0  ;;  %v252_v51 = vmul.f32 %v248_v48, %v248_v48  ;;  %v250_v52 = vmul.f32 0.03125, %v246_v49  ;;  %v258_v62 = vsub.f32 %v236_v39, %v248_v48 }
 0x26c   :  { %v259_v53 = vadd.f32 1e-05, %v255_v50  ;;  %v254_v54 = vsub.f32 %v250_v52, %v252_v51 }
 0x26e   :  { %381 = vrsqrt.f32 %v259_v53  ;;  %v256_v55 = vmax.f32 %v254_v54, 0.0 }
 0x270   :  { %v260_v56 = vadd.f32 1e-05, %v256_v55 }
 0x272   :  { %383 = vrsqrt.f32 %v260_v56 }
 0x278   :  { %v382_v58 = vpop.eup %381 }
 0x279   :  { %v263_v60 = vmul.f32 %v382_v58, %v257_v57 }
 0x27b   :  { %v272_v63 = vmul.f32 %v316_v59, %v263_v60 }
 0x27c   :  { %v384_v0 = vpop.eup %383 }
 0x27d   :  { %v264_v1 = vmul.f32 %v384_v0, %v258_v62  ;;  %v281_v2 = vadd.f32 %v317_v61, %v272_v63 }
 0x27f   :  { %v273_v3 = vmul.f32 %v316_v59, %v264_v1  ;;  %283 = vst [vmem:[#allocation2] sm:$0xff] %v281_v2 }
 0x281   :  { %v282_v4 = vadd.f32 %v317_v61, %v273_v3 }
 0x283   :  { %284 = vst [vmem:[#allocation2 + $0x8] sm:$0xff] %v282_v4 }
 0x284   :  { %396 = shalt.err (!%p393_p4)
}
 0x285   :  { %s397_s12 = scalar_lea.hbm %s527_s7, 256 }
 0x286   :  { %p398_p5 = scmp.ne.s32.totalorder %s527_s7, %s397_s12  ;;  %p401_p6 = scmp.lt.u32.totalorder %s397_s12, %s527_s7 }
 0x288   :  { %p403_p7 = pnand %p401_p6, %p398_p5 }
 0x28a   :  { %406 = shalt.err (!%p403_p7)
}
 0x28b   :  { %s412_s17 = smov 128   ;;  %s413_s18 = smov 8  }
 0x28c   :  { %296 = dma.vmem_to_hbm [thread:$0]  %s291_s10, 256, %s527_s7, [#allocation3], %s412_s17, %s412_s17, %s413_s18  }
 0x28d   :  { %407 = dma.done.wait [#allocation3], 256  }
 0x28e   :  { %408 = vsyncadd [#allocation3], 4294967040 }
 0x28f   :  { %300 = vsyncpa [#allocation3], 1 }

</bundles_post_ra>
